<compile_context>
chip_gen: v7x
topology: tpu7x:2x2x1
jax: 0.10.0
libtpu: 0.0.40
codegen_flags: <defaults>
</compile_context>

<pallas_src>
import jax
import jax.numpy as jnp
from jax.experimental import pallas as pl
from jax.experimental.pallas import tpu as pltpu


def _round_up(x, m):
    return ((x + m - 1) // m) * m


def _vmem_capacity_bytes():
    """Per-TensorCore VMEM capacity; conservative fallback fits every chip."""
    try:
        info = pltpu.get_tpu_info()
        cap = int(getattr(info, "vmem_capacity_bytes", 0))
        if cap > 0:
            return cap
    except Exception:
        pass
    return 64 * 1024 * 1024  # v7x per-TC VMEM; v5e/v6e have 128 MiB


def _blg_kernel(const_ref, j_ref, sigma_ref, mu_ref, out_ref):
    # const_ref: (1,1) SMEM f32
    # j_ref    : (TB, D)  input rows (f32 or bf16), streamed per grid step
    # sigma_ref: (D, D)   pre-scaled 0.5*sigma (resident across grid steps)
    # mu_ref   : (1, D)   f32 (resident)
    # out_ref  : (TB, 1)  f32
    jt = j_ref[...]
    # (TB, D) @ (D, D) on the MXU, f32 accumulation.
    q = jnp.dot(jt, sigma_ref[...], preferred_element_type=jnp.float32)
    # exponent_b = sum_d j[b,d] * ((j @ 0.5*sigma)[b,d] + mu[d])
    #            = 0.5 * j^T sigma j + j^T mu   (holds without assuming symmetry)
    expo = jnp.sum(jt.astype(jnp.float32) * (q + mu_ref[...]),
                   axis=1, keepdims=True)                              # (TB, 1)
    out_ref[...] = (const_ref[0, 0] * jnp.exp(expo)).astype(out_ref.dtype)


def bilateral_laplace_gaussian(j, const, sigma, mu):
    """j: (D,) or (B, D); const scalar; sigma (D, D); mu (D,).

    Returns a scalar for a single j, or a (B,) float32 vector for a batch of
    j rows.  j is streamed in its incoming dtype (pass bf16 upstream to halve
    the dominant HBM stream); the quadratic form accumulates in f32.
    """
    single = (j.ndim == 1)
    j2 = j[None, :] if single else j
    B, D = j2.shape

    # Batch (sublane) axis must be tileable by 8; only tiny B needs a pad.
    B8 = _round_up(B, 8)
    if B8 != B:
        j2 = jnp.pad(j2, ((0, B8 - B), (0, 0)))   # zero rows -> exp(0), sliced off

    itemsize = jnp.dtype(j2.dtype).itemsize
    d_pad = _round_up(D, 128)                      # VMEM lane padding of last dim

    # ---- batch tile size from the VMEM budget --------------------------------
    vmem_budget = int(0.75 * _vmem_capacity_bytes())
    # <= ~8 MiB per j buffer (x2 for double buffering), and never more than a
    # quarter of the budget so out tiles + resident sigma/mu + headroom fit too.
    tile_cap = min(8 * 1024 * 1024, vmem_budget // 4)
    tb_max = max(8, (tile_cap // max(1, d_pad * itemsize)) // 8 * 8)
    TB = min(B8, tb_max)
    n_steps = pl.cdiv(B8, TB)
    # Keep >= 4 grid steps for large B (v7x: 2 TensorCores + double-buffering),
    # but only when each step still gets a substantial tile.
    if n_steps < 4 and B8 // 4 >= 1024:
        TB = _round_up(pl.cdiv(B8, 4), 8)
        n_steps = pl.cdiv(B8, TB)
    # Rebalance so the last (ragged) tile is not mostly empty.
    TB = max(8, _round_up(pl.cdiv(B8, n_steps), 8))
    n_steps = pl.cdiv(B8, TB)

    # ---- operands -------------------------------------------------------------
    sigma_half = (0.5 * sigma).astype(j2.dtype)    # fold the 0.5 into sigma (DxD, tiny)
    mu_row = mu.astype(jnp.float32).reshape(1, D)
    const_arr = jnp.asarray(const, jnp.float32).reshape(1, 1)

    # ---- VMEM limit, clamped to the actual chip (valid on v7x's 64 MiB) -------
    need = (2 * TB * d_pad * itemsize                    # double-buffered j tiles
            + 2 * TB * 128 * 4                           # double-buffered out tiles
            + 2 * _round_up(D, 8) * d_pad * itemsize     # sigma (default 2 buffers)
            + 2 * 8 * d_pad * 4)                         # mu
    # TODO(synk): single-buffer the resident sigma/mu blocks and add a D-reduction
    #             grid axis (accumulator + pl.when init/finalize) once
    #             2*D*D*itemsize exceeds ~24 MiB, so large-D fits v7x's 64 MiB.
    vmem_limit = int(min(vmem_budget, max(32 * 1024 * 1024, need + (4 << 20))))

    out = pl.pallas_call(
        _blg_kernel,
        grid=(n_steps,),
        out_shape=jax.ShapeDtypeStruct((B8, 1), jnp.float32),
        in_specs=[
            pl.BlockSpec(memory_space=pltpu.SMEM),            # const (1,1)
            pl.BlockSpec((TB, D), lambda i: (i, 0)),          # j rows (streamed)
            pl.BlockSpec((D, D), lambda i: (0, 0)),           # 0.5*sigma (resident)
            pl.BlockSpec((1, D), lambda i: (0, 0)),           # mu        (resident)
        ],
        out_specs=pl.BlockSpec((TB, 1), lambda i: (i, 0)),
        compiler_params=pltpu.CompilerParams(
            dimension_semantics=("parallel",),
            vmem_limit_bytes=vmem_limit,
        ),
    )(const_arr, j2, sigma_half, mu_row)

    return out[0, 0] if single else out[:B, 0]


def _reference(j, const, sigma, mu):
    # pure-JAX mirror of: const * exp(0.5 * j @ sigma @ j + j @ mu)
    if j.ndim == 1:
        return const * jnp.exp(0.5 * (j @ sigma @ j) + j @ mu)
    quad = jnp.einsum("bk,kl,bl->b", j, sigma, j)
    lin = j @ mu
    return const * jnp.exp(0.5 * quad + lin)


if __name__ == "__main__":
    dim = 8     # dimension of the input Gaussian (g_input.dim)
    batch = 8   # batch of j argument vectors

    key = jax.random.PRNGKey(0)
    k_sigma, k_mu, k_j = jax.random.split(key, 3)

    # Deterministic synthetic Gaussian parameters (small scale -> exp stays finite).
    a = jax.random.normal(k_sigma, (dim, dim), dtype=jnp.float32) * 0.1
    sigma = 0.5 * (a + a.T)                                        # symmetric (D, D)
    mu = jax.random.normal(k_mu, (dim,), dtype=jnp.float32) * 0.1  # (D,)
    const = jnp.float32(0.75)                                      # g_input.const

    # Batched j argument (each row behaves like a single j of shape (D,)).
    j_batch = jax.random.normal(k_j, (batch, dim), dtype=jnp.float32) * 0.5
    out_batch = bilateral_laplace_gaussian(j_batch, const, sigma, mu)
    out_batch = jax.block_until_ready(out_batch)

    # Single-vector call: exactly the PyTorch forward signature (j of shape (D,)).
    j_single = j_batch[0]
    out_single = bilateral_laplace_gaussian(j_single, const, sigma, mu)
    out_single = jax.block_until_ready(out_single)

    ref_batch = _reference(j_batch, const, sigma, mu)
    ref_single = _reference(j_single, const, sigma, mu)

    assert jnp.allclose(out_batch, ref_batch, rtol=1e-5, atol=1e-5)
    assert jnp.allclose(out_single, ref_single, rtol=1e-5, atol=1e-5)

    print("KERNEL_OK")
</pallas_src>

<mosaic_0001>
module attributes {stable_mosaic.version = 11 : i64} {
  func.func @_blg_kernel(%arg0: i32, %arg1: memref<1x1xf32, #tpu.memory_space<smem>>, %arg2: memref<8x8xf32, #tpu.memory_space<vmem>>, %arg3: memref<8x8xf32, #tpu.memory_space<vmem>>, %arg4: memref<1x8xf32, #tpu.memory_space<vmem>>, %arg5: memref<8x1xf32, #tpu.memory_space<vmem>>) attributes {dimension_semantics = [#tpu.dimension_semantics<parallel>], iteration_bounds = array<i64: 1>, scalar_prefetch = 0 : i64, scratch_operands = 0 : i64, tpu.core_type = #tpu.core_type<tc>, window_params = [{transform_indices = @transform_0, window_bounds = array<i64: 1, 1>}, {transform_indices = @transform_1, window_bounds = array<i64: 8, 8>}, {pipeline_mode = #tpu.pipeline_mode<synchronous>, transform_indices = @transform_2, window_bounds = array<i64: 8, 8>}, {pipeline_mode = #tpu.pipeline_mode<synchronous>, transform_indices = @transform_3, window_bounds = array<i64: 1, 8>}, {transform_indices = @transform_4, window_bounds = array<i64: 8, 1>}]} {
    %c0 = arith.constant 0 : index
    %c0_0 = arith.constant 0 : index
    %0 = vector.load %arg2[%c0, %c0_0] : memref<8x8xf32, #tpu.memory_space<vmem>>, vector<8x8xf32>
    %c0_1 = arith.constant 0 : index
    %c0_2 = arith.constant 0 : index
    %1 = vector.load %arg3[%c0_1, %c0_2] : memref<8x8xf32, #tpu.memory_space<vmem>>, vector<8x8xf32>
    %cst = arith.constant dense<0.000000e+00> : vector<8x8xf32>
    %2 = tpu.matmul %0, %1, %cst {dimension_numbers = #tpu.dot_dimension_numbers<[1], [0], [0], [1], [0, 0, 1, 1], [], []>} : vector<8x8xf32>, vector<8x8xf32>, vector<8x8xf32> -> vector<8x8xf32>
    %c0_3 = arith.constant 0 : index
    %c0_4 = arith.constant 0 : index
    %3 = vector.load %arg4[%c0_3, %c0_4] : memref<1x8xf32, #tpu.memory_space<vmem>>, vector<1x8xf32>
    %4 = vector.broadcast %3 : vector<1x8xf32> to vector<8x8xf32>
    %5 = arith.addf %2, %4 : vector<8x8xf32>
    %6 = arith.mulf %0, %5 : vector<8x8xf32>
    %cst_5 = arith.constant dense<0.000000e+00> : vector<8xf32>
    %7 = vector.multi_reduction <add>, %6, %cst_5 [1] : vector<8x8xf32> to vector<8xf32>
    %8 = vector.shape_cast %7 : vector<8xf32> to vector<8x1xf32>
    %c0_6 = arith.constant 0 : index
    %c0_7 = arith.constant 0 : index
    %9 = memref.load %arg1[%c0_6, %c0_7] : memref<1x1xf32, #tpu.memory_space<smem>>
    %10 = math.exp %8 : vector<8x1xf32>
    %11 = vector.broadcast %9 : f32 to vector<8x1xf32>
    %12 = arith.mulf %11, %10 : vector<8x1xf32>
    %c0_8 = arith.constant 0 : index
    %c0_9 = arith.constant 0 : index
    %13 = vector.load %arg5[%c0_8, %c0_9] : memref<8x1xf32, #tpu.memory_space<vmem>>, vector<8x1xf32>
    tpu.vector_store %arg5[%c0_8, %c0_9], %12 {strides = array<i32>} : memref<8x1xf32, #tpu.memory_space<vmem>>, vector<8x1xf32>,
    return
  }
  func.func @transform_0(%arg0: i32) -> (i32, i32) {
    %c0_i32 = arith.constant 0 : i32
    %c0_i32_0 = arith.constant 0 : i32
    %c0_i32_1 = arith.constant 0 : i32
    return %c0_i32, %c0_i32_0 : i32, i32
  }
  func.func @transform_1(%arg0: i32) -> (i32, i32) {
    %c0_i32 = arith.constant 0 : i32
    %c0_i32_0 = arith.constant 0 : i32
    return %arg0, %c0_i32 : i32, i32
  }
  func.func @transform_2(%arg0: i32) -> (i32, i32) {
    %c0_i32 = arith.constant 0 : i32
    %c0_i32_0 = arith.constant 0 : i32
    %c0_i32_1 = arith.constant 0 : i32
    return %c0_i32, %c0_i32_0 : i32, i32
  }
  func.func @transform_3(%arg0: i32) -> (i32, i32) {
    %c0_i32 = arith.constant 0 : i32
    %c0_i32_0 = arith.constant 0 : i32
    %c0_i32_1 = arith.constant 0 : i32
    return %c0_i32, %c0_i32_0 : i32, i32
  }
  func.func @transform_4(%arg0: i32) -> (i32, i32) {
    %c0_i32 = arith.constant 0 : i32
    %c0_i32_0 = arith.constant 0 : i32
    return %arg0, %c0_i32 : i32, i32
  }
}

</mosaic_0001>

<bundles_post_ra>
// kernel: tpu_custom_call.1
= control target key start
LH: loop header
LB: loop body
LE: loop exit
PB: predicated region body
PF: predicated region fallthrough
CT: control target
= control target key end

     0   :  { %10 = vsyncpa [#allocation4], 0  ;;  %s267_s0 = inlined_call_operand.<no memory space> [shape: f32[1,1], index: 0, kind: input, shape index: {}]   ;;  %s268_s1 = inlined_call_operand.hbm [shape: f32[8,8], index: 1, kind: input, shape index: {}]   ;;  %s269_s2 = inlined_call_operand.hbm [shape: f32[8,8], index: 2, kind: input, shape index: {}]   ;;  %s270_s3 = inlined_call_operand.vmem [shape: f32[1,8], index: 3, kind: input, shape index: {}]   ;;  %s271_s4 = inlined_call_operand.vmem [shape: f32[8,1], index: 4, kind: output, shape index: {}]  }
   0x1   :  { %11 = vsyncpa [#allocation6], 0  ;;  %s205_s15 = smov [#allocation3]   ;;  %s206_s17 = smov [#allocation5]  }
   0x2   :  { %s20_s16 = sshll.u32 %s205_s15, 4  ;;  %s30_s18 = sshll.u32 %s206_s17, 4  ;;  %s21_s16 = int_to_ptr.vmem [resolvable:$true] %s20_s16  ;;  %s31_s18 = int_to_ptr.vmem [resolvable:$true] %s30_s18 }
   0x3   :  { %s157_s21 = scalar_lea.hbm %s268_s1, 128 }
   0x4   :  { %p158_p0 = scmp.ne.s32.totalorder %s268_s1, %s157_s21  ;;  %p161_p1 = scmp.lt.u32.totalorder %s157_s21, %s268_s1 }
   0x6   :  { %p163_p2 = pnand %p161_p1, %p158_p0 }
   0x8   :  { %166 = shalt.err (!%p163_p2)
}
   0x9   :  { %s167_s26 = scalar_lea.vmem %s21_s16, 128  ;;  %p172_p4 = scmp.lt.s32.totalorder %s21_s16, %s21_s16 }
   0xa   :  { %p168_p3 = scmp.ne.s32.totalorder %s21_s16, %s167_s26  ;;  %p173_p5 = scmp.lt.s32.totalorder %s167_s26, %s167_s26 }
   0xc   :  { %p174_p6 = por %p173_p5, %p172_p4 }
   0xe   :  { %p175_p7 = pnand %p174_p6, %p168_p3 }
  0x10   :  { %178 = shalt.err (!%p175_p7)
}
  0x11   :  { %23 = dma.hbm_to_vmem [thread:$0]  %s268_s1, 128, %s21_s16, [#allocation4]  }
  0x12   :  { %s179_s5 = scalar_lea.hbm %s269_s2, 128 }
  0x13   :  { %p180_p8 = scmp.ne.s32.totalorder %s269_s2, %s179_s5  ;;  %p183_p9 = scmp.lt.u32.totalorder %s179_s5, %s269_s2 }
  0x15   :  { %p185_p10 = pnand %p183_p9, %p180_p8 }
  0x17   :  { %188 = shalt.err (!%p185_p10)
}
  0x18   :  { %s189_s10 = scalar_lea.vmem %s31_s18, 128  ;;  %p194_p12 = scmp.lt.s32.totalorder %s31_s18, %s31_s18 }
  0x19   :  { %p190_p11 = scmp.ne.s32.totalorder %s31_s18, %s189_s10  ;;  %p195_p13 = scmp.lt.s32.totalorder %s189_s10, %s189_s10 }
  0x1b   :  { %p196_p0 = por %p195_p13, %p194_p12 }
  0x1d   :  { %p197_p1 = pnand %p196_p0, %p190_p11 }
  0x1f   :  { %200 = shalt.err (!%p197_p1)
}
  0x20   :  { %33 = dma.hbm_to_vmem [thread:$0]  %s269_s2, 128, %s31_s18, [#allocation6]  }
  0x21   :  { %201 = dma.done.wait [#allocation4], 128  }
  0x22   :  { %202 = vsyncadd [#allocation4], 4294967168 }
  0x23   :  { %203 = dma.done.wait [#allocation6], 128  }
  0x24   :  { %204 = vsyncadd [#allocation6], 4294967168  ;;  %v207_v0 = vmov 0.0   ;;  %vm208_vm0 = vmmov 0   ;;  %vm51_vm1 = vcmask 64512   ;;  %v43_v1 = vld [vmem:[#allocation5] sm:$0xff]  ;;  %v132_v11 = vstv %s267_s0 }
  0x25   :  { %146 = vmatprep.subr.mxu0 %v207_v0  ;;  %148 = vmatprep.mubr.msk.f32.mxu0 %vm208_vm0, %v207_v0  ;;  %v42_v2 = vld [vmem:[#allocation3] sm:$0xff]  ;;  %vm134_vm2 = vcmask 7168  }
  0x26   :  { %147 = vmatpush3.msra.mxu0 %v43_v1  ;;  %v142_v3 = vld [vmem:[%s270_s3] ss:$0 sm:$0xff] }
  0x27   :  { %149 = vmatmul.mubr.msk.f32.vlgmr.msra.gmra.mrb[0].mxu0 %vm51_vm1, %v42_v2 }
  0xfa   :  { %v121_v4 = vpop.f32.mrb[0].mxu0 }
  0xfb   :  { %v122_v5 = vadd.f32 %v142_v3, %v121_v4  ;;  %v150_v6 = vpop.f32.mrb[1].mxu0 }
  0xfd   :  { %v125_v7 = vmul.f32 %v122_v5, %v42_v2 }
  0xff   :  { %v126_v8 = vsel %vm51_vm1, %v125_v7, 0.0 }
 0x100   :  { %127 = vadd.xlane.f32.xlu0 %v126_v8 }
 0x18d   :  { %v128_v9 = vpop.xlane.xlu0 %127 }
 0x18e   :  { %v130_v10 = vmul.f32 1.442695, %v128_v9 }
 0x190   :  { %155 = vpow2.f32 %v130_v10 }
 0x19a   :  { %v156_v12 = vpop.eup %155 }
 0x19b   :  { %v133_v13 = vmul.f32 %v156_v12, %v132_v11 }
 0x19d   :  { %135 = vst.msk [vmem:[%s271_s4] sm:$0xff] %vm134_vm2, %v133_v13 }
 0x19e   :  { %140 = vsyncpa [#allocation4], 1 }
 0x19f   :  { %141 = vsyncpa [#allocation6], 1 }

</bundles_post_ra>
